<compile_context>
chip_gen: v5e
topology: v5e:2x2
jax: 0.10.0
libtpu: 0.0.40
codegen_flags: <defaults>
</compile_context>

<pallas_src>
import jax
import jax.numpy as jnp
from jax.experimental import pallas as pl
from jax.experimental.pallas import tpu as pltpu


# ---------------------------------------------------------------------------
# Kernels
# ---------------------------------------------------------------------------

def _expand_store(h_f32, w_ref, b_ref, o_ref):
    """o[b, s*D + d] = h[b, d] * w_flat[s*D + d] + b_flat[s*D + d].

    h_f32:        (tb, D) f32 value (already embedded if needed).
    w_ref/b_ref:  (1, S*D) refs holding the expand weight / bias pre-broadcast
                  to the flattened (s*D + d) layout (input dtype).
    o_ref:        (tb, S*D) lane-dense output ref.
    """
    _, d = h_f32.shape
    n_flat = o_ref.shape[-1]
    seq_len = n_flat // d

    if d % 128 == 0:
        # Lane-aligned chunks: write each expanded position directly.  Avoids
        # materializing a (tb, S*D) f32 temp and keeps every store a full,
        # unmasked 128-lane-multiple vst.
        def write_pos(start):
            sl = pl.ds(start, d)
            w = w_ref[:, sl].astype(jnp.float32)
            b = b_ref[:, sl].astype(jnp.float32)
            o_ref[:, sl] = (h_f32 * w + b).astype(o_ref.dtype)

        if seq_len <= 64:
            for s in range(seq_len):             # fully unrolled: LLO visibility
                write_pos(s * d)                 # static offsets
        else:
            @pl.loop(0, seq_len)
            def _(s):
                write_pos(pl.multiple_of(s * d, 128))
    else:
        # d_out not 128-aligned: keep one lane-dense full-width store so the
        # output write stays a wide contiguous vst.
        xt = jnp.tile(h_f32, (1, seq_len))                       # (tb, S*D)
        o_ref[...] = (xt * w_ref[...].astype(jnp.float32)
                      + b_ref[...].astype(jnp.float32)).astype(o_ref.dtype)


def _embed_expand_kernel(x_ref, we_ref, be_ref, w_ref, b_ref, o_ref):
    """h = x @ W_emb + b_emb (MXU, f32 accumulation); out = expand(h) (VPU)."""
    h = jnp.dot(x_ref[...], we_ref[...], preferred_element_type=jnp.float32)
    h = h + be_ref[...].astype(jnp.float32)                      # (tb, d_out) f32
    _expand_store(h, w_ref, b_ref, o_ref)


def _expand_kernel(x_ref, w_ref, b_ref, o_ref):
    """out = expand(x) (pure VPU scale + bias, lane-dense output)."""
    _expand_store(x_ref[...].astype(jnp.float32), w_ref, b_ref, o_ref)


# ---------------------------------------------------------------------------
# VMEM budgeting / tiling
# ---------------------------------------------------------------------------

def _vmem_limit_bytes():
    """Per-generation scoped-VMEM limit (leaves headroom for compiler scratch)."""
    try:
        phys = pltpu.get_tpu_info().vmem_capacity_bytes
    except Exception:
        phys = 128 * 1024 * 1024                 # conservative fallback
    if phys <= 64 * 1024 * 1024:                 # v7x-class: 64 MiB physical
        return 56 * 1024 * 1024
    return 100 * 1024 * 1024                     # v5e / v6e: 128 MiB physical


def _pick_batch_tile(batch, in_row_bytes, out_row_bytes, resident_bytes, vmem_limit):
    """Largest batch tile whose pipelined x/out tiles + resident params fit VMEM."""
    headroom = 2 * 1024 * 1024
    io_budget = max(vmem_limit - resident_bytes - headroom, 1 * 1024 * 1024)
    per_row = 2 * (in_row_bytes + out_row_bytes)   # 2-deep pipeline on x and out
    tb = io_budget // max(per_row, 1)
    tb = max(8, min(1024, (tb // 8) * 8))          # sublane-aligned, big output tiles
    if batch >= 16:
        # Guarantee >= 2 grid steps so the "parallel" batch axis can be sharded
        # across v7x's two TensorCores (harmless on 1-TC v5e / v6e).
        half = ((pl.cdiv(batch, 2) + 7) // 8) * 8
        tb = min(tb, half)
    return min(tb, batch)


# ---------------------------------------------------------------------------
# Wrapper
# ---------------------------------------------------------------------------

def dense_expander(x, seq_len, params, feat_dim_out=0, batch_tile=None):
    """Pallas implementation of DenseExpander.forward.

    x: (B, D_in) float array.
    params:
      "w_exp": (seq_len,)  expand_layer weight (Linear(1, seq_len).weight[:, 0])
      "b_exp": (seq_len,)  expand_layer bias
      if feat_dim_out:
        "w_emb": (D_in, feat_dim_out)  embedding_layer weight (pre-transposed)
        "b_emb": (feat_dim_out,)       embedding_layer bias
    returns: (B, seq_len, D_out) where D_out = feat_dim_out or D_in.
    """
    B, d_in = x.shape
    out_dtype = x.dtype
    param_dtype = x.dtype                          # bf16 inputs keep the native MXU path
    in_bytes = jnp.dtype(x.dtype).itemsize
    out_bytes = jnp.dtype(out_dtype).itemsize
    p_bytes = jnp.dtype(param_dtype).itemsize

    d_out = feat_dim_out if feat_dim_out else d_in
    n_flat = seq_len * d_out

    # Expand weight/bias pre-broadcast on the host (in f32) to the flattened
    # (s*D + d) layout, then stored in the compute input dtype.
    wexp = params["w_exp"].astype(jnp.float32).reshape(seq_len)
    bexp = params["b_exp"].astype(jnp.float32).reshape(seq_len)
    w_flat = jnp.broadcast_to(wexp[:, None], (seq_len, d_out)).reshape(1, n_flat)
    b_flat = jnp.broadcast_to(bexp[:, None], (seq_len, d_out)).reshape(1, n_flat)
    w_flat = w_flat.astype(param_dtype)
    b_flat = b_flat.astype(param_dtype)

    vmem_limit = _vmem_limit_bytes()
    compiler_params = pltpu.CompilerParams(
        dimension_semantics=("parallel",),
        vmem_limit_bytes=vmem_limit,
    )

    if feat_dim_out:
        we = params["w_emb"].astype(param_dtype)                 # (D_in, D_out)
        be = params["b_emb"].astype(param_dtype).reshape(1, d_out)

        # Resident (constant-index) blocks are double-buffered by the default
        # pipeline; count them so the x/out tiles get the remaining VMEM.
        resident = 2 * p_bytes * (d_in * d_out + d_out + 2 * n_flat)
        tb = batch_tile or _pick_batch_tile(
            B, d_in * in_bytes, n_flat * out_bytes, resident, vmem_limit)
        tb = min(tb, B)

        out_flat = pl.pallas_call(
            _embed_expand_kernel,
            out_shape=jax.ShapeDtypeStruct((B, n_flat), out_dtype),
            grid=(pl.cdiv(B, tb),),
            in_specs=[
                pl.BlockSpec((tb, d_in), lambda i: (i, 0)),        # x batch tile
                pl.BlockSpec((d_in, d_out), lambda i: (0, 0)),     # W_emb (resident)
                pl.BlockSpec((1, d_out), lambda i: (0, 0)),        # b_emb (resident)
                pl.BlockSpec((1, n_flat), lambda i: (0, 0)),       # expand weight (flat)
                pl.BlockSpec((1, n_flat), lambda i: (0, 0)),       # expand bias (flat)
            ],
            out_specs=pl.BlockSpec((tb, n_flat), lambda i: (i, 0)),  # lane-dense out
            compiler_params=compiler_params,
        )(x, we, be, w_flat, b_flat)
    else:
        resident = 2 * p_bytes * (2 * n_flat)
        tb = batch_tile or _pick_batch_tile(
            B, d_in * in_bytes, n_flat * out_bytes, resident, vmem_limit)
        tb = min(tb, B)

        out_flat = pl.pallas_call(
            _expand_kernel,
            out_shape=jax.ShapeDtypeStruct((B, n_flat), out_dtype),
            grid=(pl.cdiv(B, tb),),
            in_specs=[
                pl.BlockSpec((tb, d_in), lambda i: (i, 0)),
                pl.BlockSpec((1, n_flat), lambda i: (0, 0)),
                pl.BlockSpec((1, n_flat), lambda i: (0, 0)),
            ],
            out_specs=pl.BlockSpec((tb, n_flat), lambda i: (i, 0)),
            compiler_params=compiler_params,
        )(x, w_flat, b_flat)

    return out_flat.reshape(B, seq_len, d_out)


# ---------------------------------------------------------------------------
# Pure-JAX reference + tests
# ---------------------------------------------------------------------------

def _reference(x, seq_len, params, feat_dim_out=0):
    h = x.astype(jnp.float32)
    if feat_dim_out:
        h = h @ params["w_emb"].astype(jnp.float32) + params["b_emb"].astype(jnp.float32)
    # (B, D, 1) @ W(1 -> S) == outer product, then permute(0, 2, 1)
    out = (h[:, None, :] * params["w_exp"].astype(jnp.float32)[None, :, None]
           + params["b_exp"].astype(jnp.float32)[None, :, None])
    return out.astype(x.dtype)


if __name__ == "__main__":
    key = jax.random.PRNGKey(0)
    keys = jax.random.split(key, 8)

    # --- small shapes, d_out NOT 128-aligned (lane-dense tiled store path) ---
    B, D_IN, FEAT_DIM_OUT, SEQ_LEN = 2, 32, 16, 8
    x = jax.random.normal(keys[0], (B, D_IN), dtype=jnp.float32)
    params = {
        "w_emb": jax.random.normal(keys[1], (D_IN, FEAT_DIM_OUT), dtype=jnp.float32) * 0.1,
        "b_emb": jax.random.normal(keys[2], (FEAT_DIM_OUT,), dtype=jnp.float32) * 0.1,
        "w_exp": jax.random.normal(keys[3], (SEQ_LEN,), dtype=jnp.float32) * 0.1,
        "b_exp": jax.random.normal(keys[4], (SEQ_LEN,), dtype=jnp.float32) * 0.1,
    }

    out = jax.block_until_ready(dense_expander(x, SEQ_LEN, params, feat_dim_out=FEAT_DIM_OUT))
    ref = _reference(x, SEQ_LEN, params, feat_dim_out=FEAT_DIM_OUT)
    assert out.shape == (B, SEQ_LEN, FEAT_DIM_OUT), out.shape
    assert jnp.allclose(out, ref, atol=1e-5, rtol=1e-5)

    out2 = jax.block_until_ready(dense_expander(x, SEQ_LEN, params, feat_dim_out=0))
    ref2 = _reference(x, SEQ_LEN, params, feat_dim_out=0)
    assert out2.shape == (B, SEQ_LEN, D_IN), out2.shape
    assert jnp.allclose(out2, ref2, atol=1e-5, rtol=1e-5)

    # --- larger batch: multi-step grid over B (explicit tile of 8) ---
    B2 = 32
    x2 = jax.random.normal(keys[5], (B2, D_IN), dtype=jnp.float32)
    out3 = jax.block_until_ready(
        dense_expander(x2, SEQ_LEN, params, feat_dim_out=FEAT_DIM_OUT, batch_tile=8))
    assert out3.shape == (B2, SEQ_LEN, FEAT_DIM_OUT), out3.shape
    assert jnp.allclose(out3, _reference(x2, SEQ_LEN, params, feat_dim_out=FEAT_DIM_OUT),
                        atol=1e-5, rtol=1e-5)

    out4 = jax.block_until_ready(
        dense_expander(x2, SEQ_LEN, params, feat_dim_out=0, batch_tile=8))
    assert out4.shape == (B2, SEQ_LEN, D_IN), out4.shape
    assert jnp.allclose(out4, _reference(x2, SEQ_LEN, params, feat_dim_out=0),
                        atol=1e-5, rtol=1e-5)

    # --- 128-lane-aligned d_out: exercises the chunked per-position store path
    #     and the auto batch-tile picker (B >= 16 forces a >= 2-step grid). ---
    B3, D3_OUT = 16, 128
    x3 = jax.random.normal(keys[6], (B3, D_IN), dtype=jnp.float32)
    params3 = dict(params)
    params3["w_emb"] = jax.random.normal(keys[7], (D_IN, D3_OUT), dtype=jnp.float32) * 0.1
    params3["b_emb"] = jax.random.normal(keys[2], (D3_OUT,), dtype=jnp.float32) * 0.1
    out5 = jax.block_until_ready(dense_expander(x3, SEQ_LEN, params3, feat_dim_out=D3_OUT))
    assert out5.shape == (B3, SEQ_LEN, D3_OUT), out5.shape
    assert jnp.allclose(out5, _reference(x3, SEQ_LEN, params3, feat_dim_out=D3_OUT),
                        atol=1e-5, rtol=1e-5)

    print("KERNEL_OK")
</pallas_src>

<mosaic_0001>
module attributes {stable_mosaic.version = 11 : i64} {
  func.func @_embed_expand_kernel(%arg0: i32, %arg1: memref<2x32xf32, #tpu.memory_space<vmem>>, %arg2: memref<32x16xf32, #tpu.memory_space<vmem>>, %arg3: memref<1x16xf32, #tpu.memory_space<vmem>>, %arg4: memref<1x128xf32, #tpu.memory_space<vmem>>, %arg5: memref<1x128xf32, #tpu.memory_space<vmem>>, %arg6: memref<2x128xf32, #tpu.memory_space<vmem>>) attributes {dimension_semantics = [#tpu.dimension_semantics<parallel>], iteration_bounds = array<i64: 1>, scalar_prefetch = 0 : i64, scratch_operands = 0 : i64, tpu.core_type = #tpu.core_type<tc>, window_params = [{transform_indices = @transform_0, window_bounds = array<i64: 2, 32>}, {pipeline_mode = #tpu.pipeline_mode<synchronous>, transform_indices = @transform_1, window_bounds = array<i64: 32, 16>}, {pipeline_mode = #tpu.pipeline_mode<synchronous>, transform_indices = @transform_2, window_bounds = array<i64: 1, 16>}, {pipeline_mode = #tpu.pipeline_mode<synchronous>, transform_indices = @transform_3, window_bounds = array<i64: 1, 128>}, {pipeline_mode = #tpu.pipeline_mode<synchronous>, transform_indices = @transform_4, window_bounds = array<i64: 1, 128>}, {transform_indices = @transform_5, window_bounds = array<i64: 2, 128>}]} {
    %c0 = arith.constant 0 : index
    %c0_0 = arith.constant 0 : index
    %0 = vector.load %arg1[%c0, %c0_0] : memref<2x32xf32, #tpu.memory_space<vmem>>, vector<2x32xf32>
    %c0_1 = arith.constant 0 : index
    %c0_2 = arith.constant 0 : index
    %1 = vector.load %arg2[%c0_1, %c0_2] : memref<32x16xf32, #tpu.memory_space<vmem>>, vector<32x16xf32>
    %cst = arith.constant dense<0.000000e+00> : vector<2x16xf32>
    %2 = tpu.matmul %0, %1, %cst {dimension_numbers = #tpu.dot_dimension_numbers<[1], [0], [0], [1], [0, 0, 1, 1], [], []>} : vector<2x32xf32>, vector<32x16xf32>, vector<2x16xf32> -> vector<2x16xf32>
    %c0_3 = arith.constant 0 : index
    %c0_4 = arith.constant 0 : index
    %3 = vector.load %arg3[%c0_3, %c0_4] : memref<1x16xf32, #tpu.memory_space<vmem>>, vector<1x16xf32>
    %4 = vector.broadcast %3 : vector<1x16xf32> to vector<2x16xf32>
    %5 = arith.addf %2, %4 : vector<2x16xf32>
    %6 = tpu.concatenate %5, %5, %5, %5, %5, %5, %5, %5 in 1 : vector<2x16xf32>, vector<2x16xf32>, vector<2x16xf32>, vector<2x16xf32>, vector<2x16xf32>, vector<2x16xf32>, vector<2x16xf32>, vector<2x16xf32> -> vector<2x128xf32>
    %c0_5 = arith.constant 0 : index
    %c0_6 = arith.constant 0 : index
    %7 = vector.load %arg4[%c0_5, %c0_6] : memref<1x128xf32, #tpu.memory_space<vmem>>, vector<1x128xf32>
    %8 = vector.broadcast %7 : vector<1x128xf32> to vector<2x128xf32>
    %9 = arith.mulf %6, %8 : vector<2x128xf32>
    %c0_7 = arith.constant 0 : index
    %c0_8 = arith.constant 0 : index
    %10 = vector.load %arg5[%c0_7, %c0_8] : memref<1x128xf32, #tpu.memory_space<vmem>>, vector<1x128xf32>
    %11 = vector.broadcast %10 : vector<1x128xf32> to vector<2x128xf32>
    %12 = arith.addf %9, %11 : vector<2x128xf32>
    %c0_9 = arith.constant 0 : index
    %c0_10 = arith.constant 0 : index
    %13 = vector.load %arg6[%c0_9, %c0_10] : memref<2x128xf32, #tpu.memory_space<vmem>>, vector<2x128xf32>
    tpu.vector_store %arg6[%c0_9, %c0_10], %12 {strides = array<i32>} : memref<2x128xf32, #tpu.memory_space<vmem>>, vector<2x128xf32>,
    return
  }
  func.func @transform_0(%arg0: i32) -> (i32, i32) {
    %c0_i32 = arith.constant 0 : i32
    %c0_i32_0 = arith.constant 0 : i32
    return %arg0, %c0_i32 : i32, i32
  }
  func.func @transform_1(%arg0: i32) -> (i32, i32) {
    %c0_i32 = arith.constant 0 : i32
    %c0_i32_0 = arith.constant 0 : i32
    %c0_i32_1 = arith.constant 0 : i32
    return %c0_i32, %c0_i32_0 : i32, i32
  }
  func.func @transform_2(%arg0: i32) -> (i32, i32) {
    %c0_i32 = arith.constant 0 : i32
    %c0_i32_0 = arith.constant 0 : i32
    %c0_i32_1 = arith.constant 0 : i32
    return %c0_i32, %c0_i32_0 : i32, i32
  }
  func.func @transform_3(%arg0: i32) -> (i32, i32) {
    %c0_i32 = arith.constant 0 : i32
    %c0_i32_0 = arith.constant 0 : i32
    %c0_i32_1 = arith.constant 0 : i32
    return %c0_i32, %c0_i32_0 : i32, i32
  }
  func.func @transform_4(%arg0: i32) -> (i32, i32) {
    %c0_i32 = arith.constant 0 : i32
    %c0_i32_0 = arith.constant 0 : i32
    %c0_i32_1 = arith.constant 0 : i32
    return %c0_i32, %c0_i32_0 : i32, i32
  }
  func.func @transform_5(%arg0: i32) -> (i32, i32) {
    %c0_i32 = arith.constant 0 : i32
    %c0_i32_0 = arith.constant 0 : i32
    return %arg0, %c0_i32 : i32, i32
  }
}

</mosaic_0001>

<bundles_post_ra>
// kernel: tpu_custom_call.1
= control target key start
LH: loop header
LB: loop body
LE: loop exit
PB: predicated region body
PF: predicated region fallthrough
CT: control target
= control target key end

     0   :  { %s221_s0 = inlined_call_operand.vmem [shape: f32[2,32], index: 0, kind: input, shape index: {}]   ;;  %s222_s1 = inlined_call_operand.vmem [shape: f32[32,16], index: 1, kind: input, shape index: {}]   ;;  %s223_s2 = inlined_call_operand.vmem [shape: f32[1,16], index: 2, kind: input, shape index: {}]   ;;  %s224_s3 = inlined_call_operand.vmem [shape: f32[1,128], index: 3, kind: input, shape index: {}]   ;;  %s225_s4 = inlined_call_operand.vmem [shape: f32[1,128], index: 4, kind: input, shape index: {}]   ;;  %s226_s5 = inlined_call_operand.hbm [shape: f32[2,128], index: 5, kind: output, shape index: {}]  }
   0x1   :  { %v25_v0 = vld [vmem:[%s222_s1 + $0x18] sm:$0xff]  ;;  %v24_v1 = vld [vmem:[%s222_s1 + $0x10] sm:$0xff]  ;;  %v23_v2 = vld [vmem:[%s222_s1 + $0x8] sm:$0xff] }
   0x2   :  { %46 = vmatpush.msra.mxu0 %v25_v0 }
   0x3   :  { %10 = vsyncpa [#allocation3], 0  ;;  %v22_v3 = vld [vmem:[%s222_s1] sm:$0xff]  ;;  %vm30_vm0 = vcmask 261120   ;;  %s154_s30 = smov 80   ;;  %s155_s6 = smov 48  }
   0x4   :  { %47 = vmatpush.msra.mxu0 %v24_v1  ;;  %v21_v4 = vld [vmem:[%s221_s0] sm:$0x3]  ;;  %s156_s1 = smov 16   ;;  %s157_s7 = smov 96   ;;  %vm76_vm1 = vcmask 130048   ;;  %vm79_vm2 = vcmask 392192  }
   0x5   :  { %v125_v5 = vld [vmem:[%s223_s2] ss:$0 sm:$0xff]  ;;  %s158_s8 = smov 64   ;;  %s159_s0 = smov 32   ;;  %vm81_vm3 = vcmask 523264   ;;  %vm83_vm4 = vcmask 654336  }
   0x6   :  { %48 = vmatpush.msra.mxu0 %v23_v2  ;;  %s160_s9 = smov 112   ;;  %vm85_vm5 = vcmask 785408   ;;  %vm87_vm6 = vcmask 916480   ;;  %v126_v18 = vld [vmem:[%s224_s3] ss:$0 sm:$0xff]  ;;  %s161_s13 = smov [#allocation2]  }
   0x7   :  { %v127_v22 = vld [vmem:[%s225_s4] ss:$0 sm:$0xff]  ;;  %s105_s14 = sshll.u32 %s161_s13, 4  ;;  %s107_s17 = sshll.u32 %s226_s5, 4  ;;  %s106_s14 = int_to_ptr.vmem [resolvable:$true] %s105_s14  ;;  %s108_s17 = int_to_ptr.hbm [resolvable:$true] %s107_s17 }
   0x8   :  { %49 = vmatpush.msra.mxu0 %v22_v3 }
   0x9   :  { %116 = vmatmul.msk.f32.vlgmr.msra.gmra.mxu0 %vm30_vm0, %v21_v4 }
  0x86   :  { %v51_v6 = vpop.f32.mrf.mxu0 }
  0x87   :  { %v52_v7 = vadd.f32 %v125_v5, %v51_v6 }
  0x89   :  { %67 = vrot.lane.b32.xlu2 %v52_v7, %s154_s30  ;;  %61 = vrot.lane.b32.xlu1 %v52_v7, %s155_s6 }
  0x8a   :  { %55 = vrot.lane.b32.xlu0 %v52_v7, %s156_s1 }
  0x91   :  { %70 = vrot.lane.b32.xlu2 %v52_v7, %s157_s7  ;;  %64 = vrot.lane.b32.xlu1 %v52_v7, %s158_s8 }
  0x92   :  { %58 = vrot.lane.b32.xlu0 %v52_v7, %s159_s0 }
  0x9a   :  { %73 = vrot.lane.b32.xlu0 %v52_v7, %s160_s9 }
  0xe3   :  { %v68_v10 = vpop.permute.xlu2 %67 }
  0xeb   :  { %v71_v19 = vpop.permute.xlu2 %70 }
  0xfb   :  { %v62_v8 = vpop.permute.xlu1 %61 }
  0xfc   :  { %v56_v9 = vpop.permute.xlu0 %55 }
  0xfd   :  { %v77_v11 = vsel %vm76_vm1, %v52_v7, %v56_v9 }
 0x103   :  { %v65_v14 = vpop.permute.xlu1 %64 }
 0x104   :  { %v59_v12 = vpop.permute.xlu0 %58 }
 0x105   :  { %v78_v13 = vsel %vm30_vm0, %v77_v11, %v59_v12 }
 0x106   :  { %v80_v15 = vsel %vm79_vm2, %v78_v13, %v62_v8 }
 0x107   :  { %v82_v16 = vsel %vm81_vm3, %v80_v15, %v65_v14 }
 0x108   :  { %v84_v17 = vsel %vm83_vm4, %v82_v16, %v68_v10 }
 0x109   :  { %v86_v20 = vsel %vm85_vm5, %v84_v17, %v71_v19 }
 0x10c   :  { %v74_v21 = vpop.permute.xlu0 %73 }
 0x10d   :  { %v88_v23 = vsel %vm87_vm6, %v86_v20, %v74_v21 }
 0x10e   :  { %v93_v24 = vmul.f32 %v126_v18, %v88_v23 }
 0x110   :  { %v98_v25 = vadd.f32 %v127_v22, %v93_v24 }
 0x112   :  { %99 = vst [vmem:[#allocation2] sm:$0x3] %v98_v25 }
 0x113   :  { %110 = dma.vmem_to_hbm [thread:$0]  %s106_s14, 32, %s108_s17, [#allocation3]  }
 0x114   :  { %152 = dma.done.wait [#allocation3], 32  }
 0x115   :  { %153 = vsyncadd [#allocation3], 4294967264 }
 0x116   :  { %115 = vsyncpa [#allocation3], 1 }

</bundles_post_ra>
